<compile_context>
chip_gen: v6e
topology: v6e:2x2x1
jax: 0.10.0
libtpu: 0.0.40
codegen_flags: <defaults>
</compile_context>

<pallas_src>
import functools

import jax
import jax.numpy as jnp
from jax.experimental import pallas as pl
from jax.experimental.pallas import tpu as pltpu


# --------------------------------------------------------------------------- #
# Helpers
# --------------------------------------------------------------------------- #
def _round_up(x, m):
    return ((x + m - 1) // m) * m


def _spec(block_shape, index_map, *, single_buffer=False):
    """BlockSpec; constant-index operands request single buffering."""
    if single_buffer:
        try:
            return pl.BlockSpec(block_shape, index_map,
                                pipeline_mode=pl.Buffered(1))
        except Exception:       # older API: fall back to default double-buffer
            pass
    return pl.BlockSpec(block_shape, index_map)


def _log_softmax_masked(z, num_classes):
    """Row-wise log_softmax over the first `num_classes` lanes (rest -> -inf)."""
    col = jax.lax.broadcasted_iota(jnp.int32, z.shape, 1)
    z = jnp.where(col < num_classes, z, -jnp.inf)
    m = jnp.max(z, axis=-1, keepdims=True)
    lse = jnp.log(jnp.sum(jnp.exp(z - m), axis=-1, keepdims=True)) + m
    return z - lse


# --------------------------------------------------------------------------- #
# Kernels
# --------------------------------------------------------------------------- #
def gcn_small_kernel(a_ref, x_ref, w1_ref, w2_ref, b1_ref, b2_ref, out_ref,
                     *, num_classes):
    """Whole forward in one launch (everything VMEM-resident, no grid)."""
    xw1 = jnp.dot(x_ref[...], w1_ref[...], preferred_element_type=jnp.float32)
    h = jnp.dot(a_ref[...], xw1.astype(a_ref.dtype),
                preferred_element_type=jnp.float32)
    h = jnp.maximum(h + b1_ref[...], 0.0)
    # TODO(synk): F.dropout(training=True) omitted; eval-mode (identity) semantics.
    hw2 = jnp.dot(h.astype(w2_ref.dtype), w2_ref[...],
                  preferred_element_type=jnp.float32)
    z = jnp.dot(a_ref[...], hw2.astype(a_ref.dtype),
                preferred_element_type=jnp.float32) + b2_ref[...]
    out_ref[...] = _log_softmax_masked(z, num_classes)


def xw_kernel(x_ref, w_ref, o_ref):
    """Pass 0 (tiled path): o = X_tile @ W1  (bf16 operands, f32 accumulate)."""
    o_ref[...] = jnp.dot(
        x_ref[...], w_ref[...], preferred_element_type=jnp.float32
    ).astype(o_ref.dtype)


def fused_l12_kernel(a_ref, xw_ref, w2_ref, b1_ref, b2_ref, out_ref, hw2_ref,
                     *, tm, num_classes):
    """Fused passes 1+2 with Â VMEM-resident and HW2 carried in VMEM scratch.

    grid = (2, n_tiles): phase 0 builds HW2 tile-by-tile into `hw2_ref`;
    phase 1 re-uses the resident Â tile rows against the full HW2 and emits
    log_softmax rows.  Both axes are "arbitrary" (sequential), so the scratch
    carry is valid on single- and dual-TensorCore parts alike.
    """
    p = pl.program_id(0)
    i = pl.program_id(1)
    row0 = pl.multiple_of(i * tm, tm)
    a_tile = a_ref[pl.ds(row0, tm), :]          # (tm, n_pad) rows of resident Â

    @pl.when(p == 0)
    def _():
        h = jnp.dot(a_tile, xw_ref[...], preferred_element_type=jnp.float32)
        h = jnp.maximum(h + b1_ref[...], 0.0)   # bias + ReLU in f32 (VPU)
        # TODO(synk): F.dropout(training=True) omitted; eval-mode semantics.
        hw2 = jnp.dot(h.astype(w2_ref.dtype), w2_ref[...],
                      preferred_element_type=jnp.float32)
        hw2_ref[pl.ds(row0, tm), :] = hw2.astype(hw2_ref.dtype)

    @pl.when(p == 1)
    def _():
        z = jnp.dot(a_tile, hw2_ref[...],
                    preferred_element_type=jnp.float32) + b2_ref[...]
        out_ref[...] = _log_softmax_masked(z, num_classes)


# --------------------------------------------------------------------------- #
# Wrapper
# --------------------------------------------------------------------------- #
_VMEM_LIMIT = 48 * 1024 * 1024      # v7x-safe (64 MiB physical), <= review's ~56 MiB


def _gcn_forward_impl(a_norm, x, w1, b1, w2, b2, *, tm=256, use_small=None):
    """log_softmax(Â relu(Â X W1 + b1) W2 + b2); returns [N, C] float32."""
    n, f_in = x.shape
    hidden = w1.shape[1]
    c = w2.shape[1]

    lane = 128
    hp = _round_up(max(hidden, lane), lane)        # hidden padded to 128 lanes
    cp = _round_up(max(c, lane), lane)             # classes padded to 128 lanes
    f_in_pad = _round_up(f_in, lane)               # lane-aligned K for pass 0
    tm = max(lane, _round_up(tm, lane))            # 128-aligned row tile

    f32, bf16 = jnp.float32, jnp.bfloat16

    # Decide path: single fused launch if the whole problem sits in VMEM.
    n_small = _round_up(max(n, lane), lane)
    est_small = (2 * (n_small * n_small + n_small * f_in_pad
                      + f_in_pad * hp + hp * cp)          # bf16 operands
                 + 4 * n_small * cp                       # f32 output
                 + 4 * 3 * n_small * max(hp, cp))         # f32 temporaries
    if use_small is None:
        use_small = est_small <= 16 * 1024 * 1024

    n_pad = n_small if use_small else _round_up(n, tm)

    # Build padded operands directly in bf16 (cast-then-set; stays in this jit).
    a_p = jnp.zeros((n_pad, n_pad), bf16).at[:n, :n].set(a_norm.astype(bf16))
    x_p = jnp.zeros((n_pad, f_in_pad), bf16).at[:n, :f_in].set(x.astype(bf16))
    w1_p = jnp.zeros((f_in_pad, hp), bf16).at[:f_in, :hidden].set(w1.astype(bf16))
    w2_p = jnp.zeros((hp, cp), bf16).at[:hidden, :c].set(w2.astype(bf16))
    b1_p = jnp.zeros((1, hp), f32).at[:, :hidden].set(jnp.reshape(b1, (1, hidden)))
    b2_p = jnp.zeros((1, cp), f32).at[:, :c].set(jnp.reshape(b2, (1, c)))

    if use_small:
        # ---- toy scale: one launch, no grid, whole arrays in VMEM ---------
        out_p = pl.pallas_call(
            functools.partial(gcn_small_kernel, num_classes=c),
            out_shape=jax.ShapeDtypeStruct((n_pad, cp), f32),
            compiler_params=pltpu.CompilerParams(vmem_limit_bytes=_VMEM_LIMIT),
        )(a_p, x_p, w1_p, w2_p, b1_p, b2_p)
        return out_p[:n, :c]

    # ---- large scale: pass 0 (stream X) + fused passes 1&2 (Â resident) ----
    n_tiles = n_pad // tm

    xw1 = pl.pallas_call(
        xw_kernel,
        out_shape=jax.ShapeDtypeStruct((n_pad, hp), bf16),
        grid=(n_tiles,),
        in_specs=[
            pl.BlockSpec((tm, f_in_pad), lambda i: (i, 0)),              # X tile
            _spec((f_in_pad, hp), lambda i: (0, 0), single_buffer=True),  # W1
        ],
        out_specs=pl.BlockSpec((tm, hp), lambda i: (i, 0)),
        compiler_params=pltpu.CompilerParams(
            dimension_semantics=("parallel",),
            vmem_limit_bytes=_VMEM_LIMIT),
    )(x_p, w1_p)

    out_p = pl.pallas_call(
        functools.partial(fused_l12_kernel, tm=tm, num_classes=c),
        out_shape=jax.ShapeDtypeStruct((n_pad, cp), f32),
        grid=(2, n_tiles),                       # (phase, row tile)
        in_specs=[
            _spec((n_pad, n_pad), lambda p, i: (0, 0), single_buffer=True),  # Â resident
            _spec((n_pad, hp), lambda p, i: (0, 0), single_buffer=True),     # XW1
            _spec((hp, cp), lambda p, i: (0, 0), single_buffer=True),        # W2
            _spec((1, hp), lambda p, i: (0, 0), single_buffer=True),         # b1
            _spec((1, cp), lambda p, i: (0, 0), single_buffer=True),         # b2
        ],
        # Phase 0 parks the (unwritten) output on block 0; phase 1 walks blocks
        # 0..T-1, so every block-index run is consecutive (no stale writeback).
        out_specs=pl.BlockSpec((tm, cp), lambda p, i: (i * p, 0)),
        scratch_shapes=[pltpu.VMEM((n_pad, cp), bf16)],   # persistent HW2 carry
        compiler_params=pltpu.CompilerParams(
            dimension_semantics=("arbitrary", "arbitrary"),
            vmem_limit_bytes=_VMEM_LIMIT),
    )(a_p, xw1, w2_p, b1_p, b2_p)

    return out_p[:n, :c]


gcn_forward = jax.jit(_gcn_forward_impl, static_argnames=("tm", "use_small"))


# --------------------------------------------------------------------------- #
# Plain-JAX glue + reference
# --------------------------------------------------------------------------- #
def normalized_adjacency(edge_index, num_nodes):
    """Dense D^{-1/2} (A + I) D^{-1/2} from a (2, E) edge_index."""
    src, dst = edge_index[0], edge_index[1]
    adj = jnp.zeros((num_nodes, num_nodes), jnp.float32)
    adj = adj.at[dst, src].set(1.0)
    adj = adj.at[src, dst].set(1.0)                                  # undirected
    adj = jnp.maximum(adj, jnp.eye(num_nodes, dtype=jnp.float32))    # self-loops
    deg = jnp.sum(adj, axis=1)
    d_inv_sqrt = jnp.where(deg > 0, 1.0 / jnp.sqrt(deg), 0.0)
    return adj * d_inv_sqrt[:, None] * d_inv_sqrt[None, :]


def gcn_reference(a_norm, x, w1, b1, w2, b2):
    h = jnp.maximum(a_norm @ (x @ w1) + b1, 0.0)
    z = a_norm @ (h @ w2) + b2
    return jax.nn.log_softmax(z, axis=1)


def glorot(key, shape):
    fan_in, fan_out = shape
    limit = jnp.sqrt(6.0 / (fan_in + fan_out))
    return jax.random.uniform(key, shape, jnp.float32, -limit, limit)


if __name__ == "__main__":
    # Small synthetic "Cora-like" graph.
    N = 32          # num nodes
    F_IN = 16       # dataset.num_node_features
    HIDDEN = 16     # GCNConv hidden width (fixed by the module)
    C = 8           # dataset.num_classes
    E = 64          # num edges

    key = jax.random.PRNGKey(0)
    k_x, k_e, k_w1, k_w2, k_x2, k_e2 = jax.random.split(key, 6)

    x = jax.random.normal(k_x, (N, F_IN), jnp.float32)
    edge_index = jax.random.randint(k_e, (2, E), 0, N, jnp.int32)

    w1 = glorot(k_w1, (F_IN, HIDDEN))
    b1 = jnp.zeros((1, HIDDEN), jnp.float32)
    w2 = glorot(k_w2, (HIDDEN, C))
    b2 = jnp.zeros((1, C), jnp.float32)

    a_norm = normalized_adjacency(edge_index, N)

    # ---- toy scale: single fused no-grid launch -----------------------------
    out = gcn_forward(a_norm, x, w1, b1, w2, b2)
    jax.block_until_ready(out)
    assert out.shape == (N, C) and out.dtype == jnp.float32
    assert bool(jnp.allclose(jnp.sum(jnp.exp(out), axis=1), 1.0, atol=1e-4))
    ref = gcn_reference(a_norm, x, w1, b1, w2, b2)
    assert bool(jnp.max(jnp.abs(out - ref)) < 0.2)

    # ---- exercise the tiled / Â-resident pipeline (the Cora-scale path) -----
    N2, E2 = 320, 1024
    x2 = jax.random.normal(k_x2, (N2, F_IN), jnp.float32)
    edge_index2 = jax.random.randint(k_e2, (2, E2), 0, N2, jnp.int32)
    a_norm2 = normalized_adjacency(edge_index2, N2)

    out2 = gcn_forward(a_norm2, x2, w1, b1, w2, b2, use_small=False)
    jax.block_until_ready(out2)
    assert out2.shape == (N2, C) and out2.dtype == jnp.float32
    assert bool(jnp.allclose(jnp.sum(jnp.exp(out2), axis=1), 1.0, atol=1e-4))
    ref2 = gcn_reference(a_norm2, x2, w1, b1, w2, b2)
    assert bool(jnp.max(jnp.abs(out2 - ref2)) < 0.25)

    print("KERNEL_OK")
</pallas_src>

<mosaic_0001>
module attributes {stable_mosaic.version = 11 : i64} {
  func.func @gcn_small_kernel(%arg0: memref<128x128xbf16, #tpu.memory_space<vmem>>, %arg1: memref<128x128xbf16, #tpu.memory_space<vmem>>, %arg2: memref<128x128xbf16, #tpu.memory_space<vmem>>, %arg3: memref<128x128xbf16, #tpu.memory_space<vmem>>, %arg4: memref<1x128xf32, #tpu.memory_space<vmem>>, %arg5: memref<1x128xf32, #tpu.memory_space<vmem>>, %arg6: memref<128x128xf32, #tpu.memory_space<vmem>>) attributes {dimension_semantics = [], scalar_prefetch = 0 : i64, scratch_operands = 0 : i64, tpu.core_type = #tpu.core_type<tc>} {
    %c0 = arith.constant 0 : index
    %c0_0 = arith.constant 0 : index
    %0 = vector.load %arg1[%c0, %c0_0] : memref<128x128xbf16, #tpu.memory_space<vmem>>, vector<128x128xbf16>
    %c0_1 = arith.constant 0 : index
    %c0_2 = arith.constant 0 : index
    %1 = vector.load %arg2[%c0_1, %c0_2] : memref<128x128xbf16, #tpu.memory_space<vmem>>, vector<128x128xbf16>
    %cst = arith.constant dense<0.000000e+00> : vector<128x128xf32>
    %2 = tpu.matmul %0, %1, %cst {dimension_numbers = #tpu.dot_dimension_numbers<[1], [0], [0], [1], [0, 0, 1, 1], [], []>} : vector<128x128xbf16>, vector<128x128xbf16>, vector<128x128xf32> -> vector<128x128xf32>
    %c0_3 = arith.constant 0 : index
    %c0_4 = arith.constant 0 : index
    %3 = vector.load %arg0[%c0_3, %c0_4] : memref<128x128xbf16, #tpu.memory_space<vmem>>, vector<128x128xbf16>
    %4 = arith.truncf %2 : vector<128x128xf32> to vector<128x128xbf16>
    %cst_5 = arith.constant dense<0.000000e+00> : vector<128x128xf32>
    %5 = tpu.matmul %3, %4, %cst_5 {dimension_numbers = #tpu.dot_dimension_numbers<[1], [0], [0], [1], [0, 0, 1, 1], [], []>} : vector<128x128xbf16>, vector<128x128xbf16>, vector<128x128xf32> -> vector<128x128xf32>
    %c0_6 = arith.constant 0 : index
    %c0_7 = arith.constant 0 : index
    %6 = vector.load %arg4[%c0_6, %c0_7] : memref<1x128xf32, #tpu.memory_space<vmem>>, vector<1x128xf32>
    %7 = vector.broadcast %6 : vector<1x128xf32> to vector<128x128xf32>
    %8 = arith.addf %5, %7 : vector<128x128xf32>
    %cst_8 = arith.constant 0.000000e+00 : f32
    %9 = vector.broadcast %cst_8 : f32 to vector<128x128xf32>
    %10 = arith.maximumf %8, %9 : vector<128x128xf32>
    %11 = arith.truncf %10 : vector<128x128xf32> to vector<128x128xbf16>
    %c0_9 = arith.constant 0 : index
    %c0_10 = arith.constant 0 : index
    %12 = vector.load %arg3[%c0_9, %c0_10] : memref<128x128xbf16, #tpu.memory_space<vmem>>, vector<128x128xbf16>
    %cst_11 = arith.constant dense<0.000000e+00> : vector<128x128xf32>
    %13 = tpu.matmul %11, %12, %cst_11 {dimension_numbers = #tpu.dot_dimension_numbers<[1], [0], [0], [1], [0, 0, 1, 1], [], []>} : vector<128x128xbf16>, vector<128x128xbf16>, vector<128x128xf32> -> vector<128x128xf32>
    %c0_12 = arith.constant 0 : index
    %c0_13 = arith.constant 0 : index
    %14 = vector.load %arg0[%c0_12, %c0_13] : memref<128x128xbf16, #tpu.memory_space<vmem>>, vector<128x128xbf16>
    %15 = arith.truncf %13 : vector<128x128xf32> to vector<128x128xbf16>
    %cst_14 = arith.constant dense<0.000000e+00> : vector<128x128xf32>
    %16 = tpu.matmul %14, %15, %cst_14 {dimension_numbers = #tpu.dot_dimension_numbers<[1], [0], [0], [1], [0, 0, 1, 1], [], []>} : vector<128x128xbf16>, vector<128x128xbf16>, vector<128x128xf32> -> vector<128x128xf32>
    %c0_15 = arith.constant 0 : index
    %c0_16 = arith.constant 0 : index
    %17 = vector.load %arg5[%c0_15, %c0_16] : memref<1x128xf32, #tpu.memory_space<vmem>>, vector<1x128xf32>
    %18 = vector.broadcast %17 : vector<1x128xf32> to vector<128x128xf32>
    %19 = arith.addf %16, %18 : vector<128x128xf32>
    %20 = tpu.iota {dimensions = array<i32: 1>} : vector<128x128xi32>
    %c8_i32 = arith.constant 8 : i32
    %21 = vector.broadcast %c8_i32 : i32 to vector<128x128xi32>
    %22 = arith.cmpi slt, %20, %21 : vector<128x128xi32>
    %cst_17 = arith.constant 0xFF800000 : f32
    %23 = vector.broadcast %cst_17 : f32 to vector<128x128xf32>
    %24 = arith.select %22, %19, %23 : vector<128x128xi1>, vector<128x128xf32>
    %cst_18 = arith.constant dense<0xFF800000> : vector<128xf32>
    %25 = vector.multi_reduction <maximumf>, %24, %cst_18 [1] : vector<128x128xf32> to vector<128xf32>
    %26 = vector.shape_cast %25 : vector<128xf32> to vector<128x1xf32>
    %27 = vector.broadcast %26 : vector<128x1xf32> to vector<128x128xf32>
    %28 = arith.subf %24, %27 : vector<128x128xf32>
    %29 = math.exp %28 : vector<128x128xf32>
    %cst_19 = arith.constant dense<0.000000e+00> : vector<128xf32>
    %30 = vector.multi_reduction <add>, %29, %cst_19 [1] : vector<128x128xf32> to vector<128xf32>
    %31 = vector.shape_cast %30 : vector<128xf32> to vector<128x1xf32>
    %32 = math.log %31 : vector<128x1xf32>
    %33 = arith.addf %32, %26 : vector<128x1xf32>
    %34 = vector.broadcast %33 : vector<128x1xf32> to vector<128x128xf32>
    %35 = arith.subf %24, %34 : vector<128x128xf32>
    %c0_20 = arith.constant 0 : index
    %c0_21 = arith.constant 0 : index
    %36 = vector.load %arg6[%c0_20, %c0_21] : memref<128x128xf32, #tpu.memory_space<vmem>>, vector<128x128xf32>
    tpu.vector_store %arg6[%c0_20, %c0_21], %35 {strides = array<i32>} : memref<128x128xf32, #tpu.memory_space<vmem>>, vector<128x128xf32>,
    return
  }
}

</mosaic_0001>

<bundles_post_ra>
// kernel: _gcn_forward_impl.1
= control target key start
LH: loop header
LB: loop body
LE: loop exit
PB: predicated region body
PF: predicated region fallthrough
CT: control target
= control target key end

     0   :  { %s1655_s2 = inlined_call_operand.vmem [shape: bf16[128,128], index: 2, kind: input, shape index: {}]   ;;  %s1656_s1 = inlined_call_operand.vmem [shape: bf16[128,128], index: 1, kind: input, shape index: {}]   ;;  %s1657_s0 = inlined_call_operand.vmem [shape: bf16[128,128], index: 0, kind: input, shape index: {}]   ;;  %s1658_s3 = inlined_call_operand.vmem [shape: bf16[128,128], index: 3, kind: input, shape index: {}]   ;;  %s1659_s4 = inlined_call_operand.vmem [shape: f32[1,128], index: 4, kind: input, shape index: {}]   ;;  %s1660_s5 = inlined_call_operand.vmem [shape: f32[1,128], index: 5, kind: input, shape index: {}]   ;;  %s1661_s6 = inlined_call_operand.vmem [shape: f32[128,128], index: 6, kind: output, shape index: {}]  }
   0x1   :  { %v1163_v0 = vld [vmem:[%s1655_s2 + $0x38] sm:$0xff]   ;;  %v1164_v1 = vld [vmem:[%s1655_s2 + $0x30] sm:$0xff]   ;;  %v1165_v2 = vld [vmem:[%s1655_s2 + $0x28] sm:$0xff]  }
   0x2   :  { %1035 = vmatprep.subr.bf16.mxu0 %v1163_v0  ;;  %v1166_v3 = vld [vmem:[%s1655_s2 + $0x20] sm:$0xff]   ;;  %v1167_v5 = vld [vmem:[%s1655_s2 + $0x18] sm:$0xff]   ;;  %v1168_v6 = vld [vmem:[%s1655_s2 + $0x10] sm:$0xff]  }
   0x3   :  { %1036 = vmatpush3.bf16.msra.mxu0 %v1163_v0  ;;  %v1171_v4 = vld [vmem:[%s1656_s1] sm:$0xff]   ;;  %v1169_v7 = vld [vmem:[%s1655_s2 + $0x8] sm:$0xff]   ;;  %v1173_v10 = vld [vmem:[%s1656_s1 + $0x10] sm:$0xff]  }
   0x4   :  { %1037 = vmatprep.subr.bf16.mxu0 %v1164_v1  ;;  %1051 = vmatprep.mubr.bf16.mxu0 %v1171_v4  ;;  %v1170_v8 = vld [vmem:[%s1655_s2] sm:$0xff]   ;;  %v1172_v9 = vld [vmem:[%s1656_s1 + $0x8] sm:$0xff]   ;;  %v1174_v11 = vld [vmem:[%s1656_s1 + $0x18] sm:$0xff]  }
   0x5   :  { %v1175_v12 = vld [vmem:[%s1656_s1 + $0x20] sm:$0xff]   ;;  %v1176_v13 = vld [vmem:[%s1656_s1 + $0x28] sm:$0xff]   ;;  %v1177_v14 = vld [vmem:[%s1656_s1 + $0x30] sm:$0xff]  }
   0x6   :  { %v1178_v15 = vld [vmem:[%s1656_s1 + $0x38] sm:$0xff]   ;;  %v1345_v16 = vld [vmem:[%s1657_s0] sm:$0xff]   ;;  %v1188_v18 = vld [vmem:[%s1658_s3 + $0x30] sm:$0xff]  }
   0x7   :  { %1038 = vmatpush3.bf16.msra.mxu0 %v1164_v1  ;;  %1083 = vmatprep.mubr.bf16.mxu1 %v1345_v16  ;;  %v1187_v17 = vld [vmem:[%s1658_s3 + $0x38] sm:$0xff]   ;;  %v1189_v19 = vld [vmem:[%s1658_s3 + $0x28] sm:$0xff]   ;;  %v1190_v20 = vld [vmem:[%s1658_s3 + $0x20] sm:$0xff]  }
   0x8   :  { %1039 = vmatprep.subr.bf16.mxu0 %v1165_v2  ;;  %v1191_v21 = vld [vmem:[%s1658_s3 + $0x18] sm:$0xff]   ;;  %v1366_v46 = vld [vmem:[%s1657_s0 + $0x8] sm:$0xff]   ;;  %v1371_v47 = vld [vmem:[%s1657_s0 + $0x10] sm:$0xff]  }
   0x9   :  { %v1378_v48 = vld [vmem:[%s1657_s0 + $0x18] sm:$0xff]   ;;  %v1383_v49 = vld [vmem:[%s1657_s0 + $0x20] sm:$0xff]   ;;  %v1390_v50 = vld [vmem:[%s1657_s0 + $0x28] sm:$0xff]  }
   0xa   :  { %v1395_v51 = vld [vmem:[%s1657_s0 + $0x30] sm:$0xff]   ;;  %v1402_v52 = vld [vmem:[%s1657_s0 + $0x38] sm:$0xff]   ;;  %v1193_v54 = vld [vmem:[%s1658_s3 + $0x8] sm:$0xff]  }
   0xb   :  { %1040 = vmatpush3.bf16.msra.mxu0 %v1165_v2  ;;  %v1192_v53 = vld [vmem:[%s1658_s3 + $0x10] sm:$0xff]   ;;  %v1194_v55 = vld [vmem:[%s1658_s3] sm:$0xff]  }
   0xc   :  { %1041 = vmatprep.subr.bf16.mxu0 %v1166_v3  ;;  %v953_v58 = vld [vmem:[%s1659_s4] ss:$0 sm:$0xff] }
   0xf   :  { %1042 = vmatpush3.bf16.msra.mxu0 %v1166_v3 }
  0x10   :  { %1043 = vmatprep.subr.bf16.mxu0 %v1167_v5 }
  0x13   :  { %1044 = vmatpush3.bf16.msra.mxu0 %v1167_v5 }
  0x14   :  { %1045 = vmatprep.subr.bf16.mxu0 %v1168_v6 }
  0x17   :  { %1046 = vmatpush3.bf16.msra.mxu0 %v1168_v6 }
  0x18   :  { %1047 = vmatprep.subr.bf16.mxu0 %v1169_v7 }
  0x1b   :  { %1048 = vmatpush3.bf16.msra.mxu0 %v1169_v7 }
  0x1c   :  { %1049 = vmatprep.subr.bf16.mxu0 %v1170_v8 }
  0x1f   :  { %1050 = vmatpush3.bf16.msra.mxu0 %v1170_v8 }
  0x20   :  { %1099 = vmatprep.subr.bf16.mxu0 %v1187_v17 }
  0x22   :  { %1052 = vmatmul.mubr.bf16.vlgmr.msra.gmra.mxu0 %v1172_v9 }
  0x23   :  { %1055 = vmatprep.mubr.bf16.mxu0 %v1173_v10  ;;  %1100 = vmatpush3.bf16.msra.mxu0 %v1187_v17 }
  0x24   :  { %1101 = vmatprep.subr.bf16.mxu0 %v1188_v18 }
  0x27   :  { %1102 = vmatpush3.bf16.msra.mxu0 %v1188_v18 }
  0x28   :  { %1103 = vmatprep.subr.bf16.mxu0 %v1189_v19 }
  0x2a   :  { %1056 = vmatmul.mubr.bf16.gmra.mxu0 %v1174_v11 }
  0x2b   :  { %1059 = vmatprep.mubr.bf16.mxu0 %v1175_v12  ;;  %1104 = vmatpush3.bf16.msra.mxu0 %v1189_v19 }
  0x2c   :  { %1105 = vmatprep.subr.bf16.mxu0 %v1190_v20 }
  0x2f   :  { %1106 = vmatpush3.bf16.msra.mxu0 %v1190_v20 }
  0x30   :  { %1107 = vmatprep.subr.bf16.mxu0 %v1191_v21 }
  0x32   :  { %1060 = vmatmul.mubr.bf16.gmra.mxu0 %v1176_v13 }
  0x33   :  { %1063 = vmatprep.mubr.bf16.mxu0 %v1177_v14  ;;  %1108 = vmatpush3.bf16.msra.mxu0 %v1191_v21 }
  0x34   :  { %1109 = vmatprep.subr.bf16.mxu0 %v1192_v53 }
  0x37   :  { %1110 = vmatpush3.bf16.msra.mxu0 %v1192_v53 }
  0x38   :  { %1111 = vmatprep.subr.bf16.mxu0 %v1193_v54 }
  0x3a   :  { %1064 = vmatmul.mubr.bf16.gmra.mxu0 %v1178_v15 }
  0x3b   :  { %1112 = vmatpush3.bf16.msra.mxu0 %v1193_v54 }
  0x3c   :  { %1113 = vmatprep.subr.bf16.mxu0 %v1194_v55 }
  0x3f   :  { %1114 = vmatpush3.bf16.msra.mxu0 %v1194_v55 }
  0xe2   :  { %v1053_v22 = vpop.f32.mrf.mxu0 }
  0xe4   :  { %v186_v23 = vpop.f32.mrf.mxu0 }
  0xe6   :  { %v1054_v24 = vpop.f32.mrf.mxu0 }
  0xe7   :  { %v266_v44 = vpack.c.bf16 %v1054_v24, %v1053_v22 }
  0xe8   :  { %v189_v25 = vpop.f32.mrf.mxu0 }
  0xe9   :  { %v265_v45 = vpack.c.bf16 %v189_v25, %v186_v23 }
  0xea   :  { %v1057_v26 = vpop.f32.mrf.mxu0 }
  0xec   :  { %v202_v27 = vpop.f32.mrf.mxu0 }
  0xee   :  { %v1058_v28 = vpop.f32.mrf.mxu0 }
  0xef   :  { %v268_v42 = vpack.c.bf16 %v1058_v28, %v1057_v26 }
  0xf0   :  { %v205_v29 = vpop.f32.mrf.mxu0 }
  0xf1   :  { %v267_v43 = vpack.c.bf16 %v205_v29, %v202_v27 }
  0xf2   :  { %v1061_v30 = vpop.f32.mrf.mxu0 }
  0xf4   :  { %v218_v31 = vpop.f32.mrf.mxu0 }
  0xf6   :  { %v1062_v32 = vpop.f32.mrf.mxu0 }
  0xf7   :  { %v270_v40 = vpack.c.bf16 %v1062_v32, %v1061_v30 }
  0xf8   :  { %v221_v33 = vpop.f32.mrf.mxu0 }
  0xf9   :  { %v269_v41 = vpack.c.bf16 %v221_v33, %v218_v31 }
  0xfa   :  { %v1065_v34 = vpop.f32.mrf.mxu0 }
  0xfc   :  { %v234_v35 = vpop.f32.mrf.mxu0 }
  0xfe   :  { %v1066_v36 = vpop.f32.mrf.mxu0 }
  0xff   :  { %v272_v37 = vpack.c.bf16 %v1066_v36, %v1065_v34 }
 0x100   :  { %v237_v38 = vpop.f32.mrf.mxu0 }
 0x101   :  { %v271_v39 = vpack.c.bf16 %v237_v38, %v234_v35  ;;  %1067 = vmatprep.subr.bf16.mxu1 %v272_v37 }
 0x102   :  { %1068 = vmatpush3.bf16.msra.mxu1 %v272_v37 }
 0x103   :  { %1069 = vmatprep.subr.bf16.mxu1 %v271_v39 }
 0x106   :  { %1070 = vmatpush3.bf16.msra.mxu1 %v271_v39 }
 0x107   :  { %1071 = vmatprep.subr.bf16.mxu1 %v270_v40 }
 0x10a   :  { %1072 = vmatpush3.bf16.msra.mxu1 %v270_v40 }
 0x10b   :  { %1073 = vmatprep.subr.bf16.mxu1 %v269_v41 }
 0x10e   :  { %1074 = vmatpush3.bf16.msra.mxu1 %v269_v41 }
 0x10f   :  { %1075 = vmatprep.subr.bf16.mxu1 %v268_v42 }
 0x112   :  { %1076 = vmatpush3.bf16.msra.mxu1 %v268_v42 }
 0x113   :  { %1077 = vmatprep.subr.bf16.mxu1 %v267_v43 }
 0x116   :  { %1078 = vmatpush3.bf16.msra.mxu1 %v267_v43 }
 0x117   :  { %1079 = vmatprep.subr.bf16.mxu1 %v266_v44 }
 0x11a   :  { %1080 = vmatpush3.bf16.msra.mxu1 %v266_v44 }
 0x11b   :  { %1081 = vmatprep.subr.bf16.mxu1 %v265_v45 }
 0x11e   :  { %1082 = vmatpush3.bf16.msra.mxu1 %v265_v45 }
 0x121   :  { %1084 = vmatmul.mubr.bf16.vlgmr.msra.gmra.mxu1 %v1366_v46 }
 0x122   :  { %1087 = vmatprep.mubr.bf16.mxu1 %v1371_v47 }
 0x129   :  { %1088 = vmatmul.mubr.bf16.gmra.mxu1 %v1378_v48 }
 0x12a   :  { %1091 = vmatprep.mubr.bf16.mxu1 %v1383_v49 }
 0x131   :  { %1092 = vmatmul.mubr.bf16.gmra.mxu1 %v1390_v50 }
 0x132   :  { %1095 = vmatprep.mubr.bf16.mxu1 %v1395_v51 }
 0x139   :  { %1096 = vmatmul.mubr.bf16.gmra.mxu1 %v1402_v52 }
 0x13a   :  { %1147 = vmatprep.mubr.bf16.mxu1 %v1345_v16 }
 0x1e1   :  { %v1085_v56 = vpop.f32.mrf.mxu1 }
 0x1e2   :  { %v371_v62 = vadd.f32 %v1085_v56, %v953_v58 }
 0x1e3   :  { %v362_v57 = vpop.f32.mrf.mxu1 }
 0x1e4   :  { %v363_v60 = vadd.f32 %v953_v58, %v362_v57  ;;  %v427_v5 = vmax.f32 %v371_v62, 0.0 }
 0x1e5   :  { %v1086_v59 = vpop.f32.mrf.mxu1 }
 0x1e6   :  { %v374_v61 = vadd.f32 %v1086_v59, %v953_v58  ;;  %v425_v3 = vmax.f32 %v363_v60, 0.0 }
 0x1e7   :  { %v365_v63 = vpop.f32.mrf.mxu1 }
 0x1e8   :  { %v366_v0 = vadd.f32 %v953_v58, %v365_v63  ;;  %v428_v1 = vmax.f32 %v374_v61, 0.0 }
 0x1e9   :  { %v1089_v2 = vpop.f32.mrf.mxu1 }
 0x1ea   :  { %v426_v4 = vmax.f32 %v366_v0, 0.0  ;;  %v442_v8 = vpack.c.bf16 %v428_v1, %v427_v5  ;;  %v387_v12 = vadd.f32 %v1089_v2, %v953_v58 }
 0x1eb   :  { %v378_v6 = vpop.f32.mrf.mxu1 }
 0x1ec   :  { %v441_v7 = vpack.c.bf16 %v426_v4, %v425_v3  ;;  %v379_v10 = vadd.f32 %v953_v58, %v378_v6  ;;  %v431_v19 = vmax.f32 %v387_v12, 0.0 }
 0x1ed   :  { %v1090_v9 = vpop.f32.mrf.mxu1 }
 0x1ee   :  { %v390_v11 = vadd.f32 %v1090_v9, %v953_v58  ;;  %1115 = vmatprep.mubr.bf16.mxu0 %v441_v7  ;;  %v429_v17 = vmax.f32 %v379_v10, 0.0 }
 0x1ef   :  { %v381_v13 = vpop.f32.mrf.mxu1  ;;  %1116 = vmatmul.mubr.bf16.vlgmr.msra.gmra.mxu0 %v442_v8 }
 0x1f0   :  { %v382_v14 = vadd.f32 %v953_v58, %v381_v13  ;;  %v432_v15 = vmax.f32 %v390_v11, 0.0 }
 0x1f1   :  { %v1093_v16 = vpop.f32.mrf.mxu1 }
 0x1f2   :  { %v430_v18 = vmax.f32 %v382_v14, 0.0  ;;  %v444_v22 = vpack.c.bf16 %v432_v15, %v431_v19  ;;  %v403_v26 = vadd.f32 %v1093_v16, %v953_v58  ;;  %v722_v16 = vlaneseq }
 0x1f3   :  { %v394_v20 = vpop.f32.mrf.mxu1 }
 0x1f4   :  { %v443_v21 = vpack.c.bf16 %v430_v18, %v429_v17  ;;  %v395_v24 = vadd.f32 %v953_v58, %v394_v20  ;;  %v435_v33 = vmax.f32 %v403_v26, 0.0  ;;  %v1425_v17 = vand.u32 127, %v722_v16  ;;  %v970_v18 = vld [vmem:[%s1660_s5] ss:$0 sm:$0xff] }
 0x1f5   :  { %v1094_v23 = vpop.f32.mrf.mxu1 }
 0x1f6   :  { %v406_v25 = vadd.f32 %v1094_v23, %v953_v58  ;;  %1119 = vmatprep.mubr.bf16.mxu0 %v443_v21  ;;  %v433_v31 = vmax.f32 %v395_v24, 0.0  ;;  %vm724_vm0 = vcmp.lt.s32.totalorder %v1425_v17, 8 }
 0x1f7   :  { %v397_v27 = vpop.f32.mrf.mxu1  ;;  %1120 = vmatmul.mubr.bf16.gmra.mxu0 %v444_v22 }
 0x1f8   :  { %v398_v28 = vadd.f32 %v953_v58, %v397_v27  ;;  %v436_v29 = vmax.f32 %v406_v25, 0.0 }
 0x1f9   :  { %v1097_v30 = vpop.f32.mrf.mxu1 }
 0x1fa   :  { %v434_v32 = vmax.f32 %v398_v28, 0.0  ;;  %v446_v36 = vpack.c.bf16 %v436_v29, %v435_v33  ;;  %v419_v40 = vadd.f32 %v1097_v30, %v953_v58 }
 0x1fb   :  { %v410_v34 = vpop.f32.mrf.mxu1 }
 0x1fc   :  { %v445_v35 = vpack.c.bf16 %v434_v32, %v433_v31  ;;  %v411_v38 = vadd.f32 %v953_v58, %v410_v34  ;;  %v439_v53 = vmax.f32 %v419_v40, 0.0 }
 0x1fd   :  { %v1098_v37 = vpop.f32.mrf.mxu1 }
 0x1fe   :  { %v422_v39 = vadd.f32 %v1098_v37, %v953_v58  ;;  %1123 = vmatprep.mubr.bf16.mxu0 %v445_v35  ;;  %v437_v44 = vmax.f32 %v411_v38, 0.0 }
 0x1ff   :  { %v413_v41 = vpop.f32.mrf.mxu1  ;;  %1124 = vmatmul.mubr.bf16.gmra.mxu0 %v446_v36 }
 0x200   :  { %v414_v42 = vadd.f32 %v953_v58, %v413_v41  ;;  %v440_v43 = vmax.f32 %v422_v39, 0.0 }
 0x202   :  { %v438_v45 = vmax.f32 %v414_v42, 0.0  ;;  %v448_v55 = vpack.c.bf16 %v440_v43, %v439_v53 }
 0x204   :  { %v447_v54 = vpack.c.bf16 %v438_v45, %v437_v44 }
 0x206   :  { %1127 = vmatprep.mubr.bf16.mxu0 %v447_v54 }
 0x207   :  { %1128 = vmatmul.mubr.bf16.gmra.mxu0 %v448_v55 }
 0x2af   :  { %v1117_v56 = vpop.f32.mrf.mxu0 }
 0x2b1   :  { %v547_v57 = vpop.f32.mrf.mxu0 }
 0x2b3   :  { %v1118_v59 = vpop.f32.mrf.mxu0 }
 0x2b4   :  { %v611_v14 = vpack.c.bf16 %v1118_v59, %v1117_v56 }
 0x2b5   :  { %v550_v60 = vpop.f32.mrf.mxu0 }
 0x2b6   :  { %v610_v15 = vpack.c.bf16 %v550_v60, %v547_v57 }
 0x2b7   :  { %v1121_v61 = vpop.f32.mrf.mxu0 }
 0x2b9   :  { %v563_v62 = vpop.f32.mrf.mxu0 }
 0x2bb   :  { %v1122_v63 = vpop.f32.mrf.mxu0 }
 0x2bc   :  { %v613_v12 = vpack.c.bf16 %v1122_v63, %v1121_v61 }
 0x2bd   :  { %v566_v0 = vpop.f32.mrf.mxu0 }
 0x2be   :  { %v612_v13 = vpack.c.bf16 %v566_v0, %v563_v62 }
 0x2bf   :  { %v1125_v1 = vpop.f32.mrf.mxu0 }
 0x2c1   :  { %v579_v2 = vpop.f32.mrf.mxu0 }
 0x2c3   :  { %v1126_v3 = vpop.f32.mrf.mxu0 }
 0x2c4   :  { %v615_v10 = vpack.c.bf16 %v1126_v3, %v1125_v1 }
 0x2c5   :  { %v582_v58 = vpop.f32.mrf.mxu0 }
 0x2c6   :  { %v614_v11 = vpack.c.bf16 %v582_v58, %v579_v2 }
 0x2c7   :  { %v1129_v4 = vpop.f32.mrf.mxu0 }
 0x2c9   :  { %v595_v5 = vpop.f32.mrf.mxu0 }
 0x2cb   :  { %v1130_v6 = vpop.f32.mrf.mxu0 }
 0x2cc   :  { %v617_v7 = vpack.c.bf16 %v1130_v6, %v1129_v4 }
 0x2cd   :  { %v598_v8 = vpop.f32.mrf.mxu0 }
 0x2ce   :  { %v616_v9 = vpack.c.bf16 %v598_v8, %v595_v5  ;;  %1131 = vmatprep.subr.bf16.mxu1 %v617_v7 }
 0x2cf   :  { %1132 = vmatpush3.bf16.msra.mxu1 %v617_v7 }
 0x2d0   :  { %1133 = vmatprep.subr.bf16.mxu1 %v616_v9 }
 0x2d3   :  { %1134 = vmatpush3.bf16.msra.mxu1 %v616_v9 }
 0x2d4   :  { %1135 = vmatprep.subr.bf16.mxu1 %v615_v10 }
 0x2d7   :  { %1136 = vmatpush3.bf16.msra.mxu1 %v615_v10 }
 0x2d8   :  { %1137 = vmatprep.subr.bf16.mxu1 %v614_v11 }
 0x2db   :  { %1138 = vmatpush3.bf16.msra.mxu1 %v614_v11 }
 0x2dc   :  { %1139 = vmatprep.subr.bf16.mxu1 %v613_v12 }
 0x2df   :  { %1140 = vmatpush3.bf16.msra.mxu1 %v613_v12 }
 0x2e0   :  { %1141 = vmatprep.subr.bf16.mxu1 %v612_v13 }
 0x2e3   :  { %1142 = vmatpush3.bf16.msra.mxu1 %v612_v13 }
 0x2e4   :  { %1143 = vmatprep.subr.bf16.mxu1 %v611_v14 }
 0x2e7   :  { %1144 = vmatpush3.bf16.msra.mxu1 %v611_v14 }
 0x2e8   :  { %1145 = vmatprep.subr.bf16.mxu1 %v610_v15 }
 0x2eb   :  { %1146 = vmatpush3.bf16.msra.mxu1 %v610_v15 }
 0x2ee   :  { %1148 = vmatmul.mubr.bf16.vlgmr.msra.gmra.mxu1 %v1366_v46 }
 0x2ef   :  { %1151 = vmatprep.mubr.bf16.mxu1 %v1371_v47 }
 0x2f6   :  { %1152 = vmatmul.mubr.bf16.gmra.mxu1 %v1378_v48 }
 0x2f7   :  { %1155 = vmatprep.mubr.bf16.mxu1 %v1383_v49 }
 0x2fe   :  { %1156 = vmatmul.mubr.bf16.gmra.mxu1 %v1390_v50 }
 0x2ff   :  { %1159 = vmatprep.mubr.bf16.mxu1 %v1395_v51 }
 0x306   :  { %1160 = vmatmul.mubr.bf16.gmra.mxu1 %v1402_v52 }
 0x3ae   :  { %v1149_v46 = vpop.f32.mrf.mxu1 }
 0x3af   :  { %v668_v47 = vadd.f32 %v1149_v46, %v970_v18 }
 0x3b0   :  { %v659_v48 = vpop.f32.mrf.mxu1 }
 0x3b1   :  { %v660_v19 = vadd.f32 %v970_v18, %v659_v48  ;;  %v1433_v49 = vsel %vm724_vm0, %v668_v47, -inf }
 0x3b2   :  { %745 = vmax.xlane.f32.xlu1 %v1433_v49  ;;  %v1150_v50 = vpop.f32.mrf.mxu1 }
 0x3b3   :  { %v671_v51 = vadd.f32 %v1150_v50, %v970_v18  ;;  %v1438_v52 = vsel %vm724_vm0, %v660_v19, -inf }
 0x3b4   :  { %v662_v20 = vpop.f32.mrf.mxu1  ;;  %741 = vmax.xlane.f32.xlu0 %v1438_v52 }
 0x3b5   :  { %v663_v21 = vadd.f32 %v970_v18, %v662_v20  ;;  %v1443_v22 = vsel %vm724_vm0, %v671_v51, -inf }
 0x3b6   :  { %747 = vmax.xlane.f32.xlu1 %v1443_v22  ;;  %v1153_v23 = vpop.f32.mrf.mxu1 }
 0x3b7   :  { %v684_v24 = vadd.f32 %v1153_v23, %v970_v18  ;;  %v1448_v25 = vsel %vm724_vm0, %v663_v21, -inf }
 0x3b8   :  { %v675_v26 = vpop.f32.mrf.mxu1  ;;  %743 = vmax.xlane.f32.xlu0 %v1448_v25 }
 0x3b9   :  { %v676_v28 = vadd.f32 %v970_v18, %v675_v26  ;;  %v1453_v30 = vsel %vm724_vm0, %v684_v24, -inf }
 0x3ba   :  { %v1154_v27 = vpop.f32.mrf.mxu1 }
 0x3bb   :  { %v687_v29 = vadd.f32 %v1154_v27, %v970_v18  ;;  %v1463_v36 = vsel %vm724_vm0, %v676_v28, -inf }
 0x3bc   :  { %v678_v31 = vpop.f32.mrf.mxu1  ;;  %753 = vmax.xlane.f32.xlu0 %v1453_v30 }
 0x3bd   :  { %v679_v32 = vadd.f32 %v970_v18, %v678_v31  ;;  %v1458_v33 = vsel %vm724_vm0, %v687_v29, -inf }
 0x3be   :  { %755 = vmax.xlane.f32.xlu1 %v1458_v33  ;;  %v1157_v34 = vpop.f32.mrf.mxu1 }
 0x3bf   :  { %v700_v35 = vadd.f32 %v1157_v34, %v970_v18  ;;  %v1468_v38 = vsel %vm724_vm0, %v679_v32, -inf }
 0x3c0   :  { %v691_v37 = vpop.f32.mrf.mxu1  ;;  %749 = vmax.xlane.f32.xlu0 %v1463_v36 }
 0x3c1   :  { %v692_v40 = vadd.f32 %v970_v18, %v691_v37  ;;  %v1473_v42 = vsel %vm724_vm0, %v700_v35, -inf }
 0x3c2   :  { %v1158_v39 = vpop.f32.mrf.mxu1  ;;  %751 = vmax.xlane.f32.xlu1 %v1468_v38 }
 0x3c3   :  { %v703_v41 = vadd.f32 %v1158_v39, %v970_v18  ;;  %v1483_v54 = vsel %vm724_vm0, %v692_v40, -inf }
 0x3c4   :  { %v694_v43 = vpop.f32.mrf.mxu1  ;;  %761 = vmax.xlane.f32.xlu0 %v1473_v42 }
 0x3c5   :  { %v695_v44 = vadd.f32 %v970_v18, %v694_v43  ;;  %v1478_v45 = vsel %vm724_vm0, %v703_v41, -inf }
 0x3c6   :  { %v1161_v53 = vpop.f32.mrf.mxu1  ;;  %763 = vmax.xlane.f32.xlu1 %v1478_v45 }
 0x3c7   :  { %v1488_v57 = vsel %vm724_vm0, %v695_v44, -inf  ;;  %v716_v60 = vadd.f32 %v1161_v53, %v970_v18 }
 0x3c8   :  { %v707_v55 = vpop.f32.mrf.mxu1  ;;  %757 = vmax.xlane.f32.xlu0 %v1483_v54 }
 0x3c9   :  { %v708_v56 = vadd.f32 %v970_v18, %v707_v55  ;;  %v1502_v2 = vsel %vm724_vm0, %v716_v60, -inf }
 0x3ca   :  { %v1162_v59 = vpop.f32.mrf.mxu1  ;;  %759 = vmax.xlane.f32.xlu1 %v1488_v57 }
 0x3cb   :  { %v1493_v61 = vsel %vm724_vm0, %v708_v56, -inf  ;;  %v719_v0 = vadd.f32 %v1162_v59, %v970_v18 }
 0x3cc   :  { %v710_v62 = vpop.f32.mrf.mxu1  ;;  %765 = vmax.xlane.f32.xlu0 %v1493_v61 }
 0x3cd   :  { %v711_v63 = vadd.f32 %v970_v18, %v710_v62  ;;  %v1508_v3 = vsel %vm724_vm0, %v719_v0, -inf }
 0x3cf   :  { %v1498_v1 = vsel %vm724_vm0, %v711_v63, -inf }
 0x3d0   :  { %767 = vmax.xlane.f32.xlu1 %v1498_v1  ;;  %769 = vmax.xlane.f32.xlu0 %v1502_v2 }
 0x3d4   :  { %771 = vmax.xlane.f32.xlu1 %v1508_v3 }
 0x43b   :  { %v1511_v58 = vpop.xlane.xlu1 %745 }
 0x43c   :  { %v775_v4 = vsub.f32 %v1433_v49, %v1511_v58 }
 0x43d   :  { %v1515_v5 = vpop.xlane.xlu0 %741 }
 0x43e   :  { %v793_v6 = vmul.f32 1.442695, %v775_v4  ;;  %v773_v7 = vsub.f32 %v1438_v52, %v1515_v5 }
 0x43f   :  { %v1519_v8 = vpop.xlane.xlu1 %747 }
 0x440   :  { %1195 = vpow2.f32 %v793_v6  ;;  %v789_v9 = vmul.f32 1.442695, %v773_v7  ;;  %v776_v10 = vsub.f32 %v1443_v22, %v1519_v8 }
 0x441   :  { %v1523_v11 = vpop.xlane.xlu0 %743 }
 0x442   :  { %v795_v12 = vmul.f32 1.442695, %v776_v10  ;;  %v774_v13 = vsub.f32 %v1448_v25, %v1523_v11  ;;  %1197 = vpow2.f32 %v789_v9 }
 0x444   :  { %1199 = vpow2.f32 %v795_v12  ;;  %v791_v14 = vmul.f32 1.442695, %v774_v13 }
 0x445   :  { %v1527_v15 = vpop.xlane.xlu0 %753 }
 0x446   :  { %v779_v16 = vsub.f32 %v1453_v30, %v1527_v15  ;;  %1201 = vpow2.f32 %v791_v14 }
 0x447   :  { %v1531_v17 = vpop.xlane.xlu1 %755 }
 0x448   :  { %v801_v18 = vmul.f32 1.442695, %v779_v16  ;;  %v780_v46 = vsub.f32 %v1458_v33, %v1531_v17 }
 0x449   :  { %v1535_v47 = vpop.xlane.xlu0 %749 }
 0x44a   :  { %1203 = vpow2.f32 %v801_v18  ;;  %v803_v48 = vmul.f32 1.442695, %v780_v46  ;;  %v777_v19 = vsub.f32 %v1463_v36, %v1535_v47 }
 0x44b   :  { %v1539_v50 = vpop.xlane.xlu1 %751 }
 0x44c   :  { %1205 = vpow2.f32 %v803_v48  ;;  %v797_v51 = vmul.f32 1.442695, %v777_v19  ;;  %v778_v20 = vsub.f32 %v1468_v38, %v1539_v50 }
 0x44d   :  { %v1196_v21 = vpop.eup %1195  ;;  %v1543_v23 = vpop.xlane.xlu0 %761 }
 0x44e   :  { %1207 = vpow2.f32 %v797_v51  ;;  %v799_v24 = vmul.f32 1.442695, %v778_v20  ;;  %v783_v26 = vsub.f32 %v1473_v42, %v1543_v23  ;;  %825 = vadd.xlane.f32.xlu0 %v1196_v21 }
 0x44f   :  { %v1547_v27 = vpop.xlane.xlu1 %763  ;;  %v1198_v28 = vpop.eup %1197 }
 0x450   :  { %1209 = vpow2.f32 %v799_v24  ;;  %v809_v29 = vmul.f32 1.442695, %v783_v26  ;;  %v784_v31 = vsub.f32 %v1478_v45, %v1547_v27 }
 0x451   :  { %v1200_v32 = vpop.eup %1199  ;;  %v1551_v34 = vpop.xlane.xlu0 %757 }
 0x452   :  { %1211 = vpow2.f32 %v809_v29  ;;  %v811_v35 = vmul.f32 1.442695, %v784_v31  ;;  %v781_v37 = vsub.f32 %v1483_v54, %v1551_v34  ;;  %827 = vadd.xlane.f32.xlu1 %v1200_v32  ;;  %821 = vadd.xlane.f32.xlu0 %v1198_v28 }
 0x453   :  { %v1555_v39 = vpop.xlane.xlu1 %759  ;;  %v1202_v43 = vpop.eup %1201 }
 0x454   :  { %1213 = vpow2.f32 %v811_v35  ;;  %v805_v40 = vmul.f32 1.442695, %v781_v37  ;;  %v782_v41 = vsub.f32 %v1488_v57, %v1555_v39 }
 0x455   :  { %v1559_v44 = vpop.xlane.xlu0 %765 }
 0x456   :  { %1215 = vpow2.f32 %v805_v40  ;;  %v807_v53 = vmul.f32 1.442695, %v782_v41  ;;  %v785_v55 = vsub.f32 %v1493_v61, %v1559_v44  ;;  %823 = vadd.xlane.f32.xlu1 %v1202_v43 }
 0x457   :  { %v1204_v56 = vpop.eup %1203 }
 0x458   :  { %1217 = vpow2.f32 %v807_v53  ;;  %v813_v59 = vmul.f32 1.442695, %v785_v55  ;;  %833 = vadd.xlane.f32.xlu0 %v1204_v56 }
 0x459   :  { %v1206_v60 = vpop.eup %1205  ;;  %v1563_v62 = vpop.xlane.xlu1 %767 }
 0x45a   :  { %v1565_v63 = vpop.xlane.xlu0 %769  ;;  %1219 = vpow2.f32 %v813_v59  ;;  %v786_v0 = vsub.f32 %v1498_v1, %v1563_v62  ;;  %835 = vadd.xlane.f32.xlu1 %v1206_v60 }
 0x45b   :  { %v787_v4 = vsub.f32 %v1502_v2, %v1565_v63  ;;  %v1208_v6 = vpop.eup %1207 }
 0x45c   :  { %v815_v7 = vmul.f32 1.442695, %v786_v0  ;;  %829 = vadd.xlane.f32.xlu0 %v1208_v6 }
 0x45d   :  { %v817_v9 = vmul.f32 1.442695, %v787_v4  ;;  %v1210_v10 = vpop.eup %1209  ;;  %v1571_v12 = vpop.xlane.xlu1 %771 }
 0x45e   :  { %1221 = vpow2.f32 %v815_v7  ;;  %v788_v13 = vsub.f32 %v1508_v3, %v1571_v12  ;;  %831 = vadd.xlane.f32.xlu1 %v1210_v10 }
 0x45f   :  { %v1212_v14 = vpop.eup %1211  ;;  %1223 = vpow2.f32 %v817_v9 }
 0x460   :  { %v819_v16 = vmul.f32 1.442695, %v788_v13  ;;  %841 = vadd.xlane.f32.xlu0 %v1212_v14 }
 0x461   :  { %v1214_v18 = vpop.eup %1213 }
 0x462   :  { %1225 = vpow2.f32 %v819_v16  ;;  %843 = vadd.xlane.f32.xlu1 %v1214_v18 }
 0x463   :  { %v1216_v46 = vpop.eup %1215 }
 0x464   :  { %837 = vadd.xlane.f32.xlu0 %v1216_v46 }
 0x465   :  { %v1218_v48 = vpop.eup %1217 }
 0x466   :  { %839 = vadd.xlane.f32.xlu1 %v1218_v48 }
 0x467   :  { %v1220_v19 = vpop.eup %1219 }
 0x468   :  { %845 = vadd.xlane.f32.xlu0 %v1220_v19 }
 0x46b   :  { %v1222_v51 = vpop.eup %1221 }
 0x46c   :  { %v1224_v20 = vpop.eup %1223  ;;  %847 = vadd.xlane.f32.xlu1 %v1222_v51 }
 0x46d   :  { %849 = vadd.xlane.f32.xlu0 %v1224_v20 }
 0x46f   :  { %v1226_v21 = vpop.eup %1225 }
 0x470   :  { %851 = vadd.xlane.f32.xlu1 %v1226_v21 }
 0x4d7   :  { %v826_v24 = vpop.xlane.xlu0 %825 }
 0x4d8   :  { %1227 = vlog2.f32 %v826_v24 }
 0x4db   :  { %v828_v26 = vpop.xlane.xlu1 %827  ;;  %v822_v28 = vpop.xlane.xlu0 %821 }
 0x4dc   :  { %1229 = vlog2.f32 %v828_v26 }
 0x4dd   :  { %1231 = vlog2.f32 %v822_v28 }
 0x4df   :  { %v824_v29 = vpop.xlane.xlu1 %823 }
 0x4e0   :  { %1233 = vlog2.f32 %v824_v29 }
 0x4e1   :  { %v834_v31 = vpop.xlane.xlu0 %833 }
 0x4e2   :  { %1235 = vlog2.f32 %v834_v31 }
 0x4e3   :  { %v836_v32 = vpop.xlane.xlu1 %835 }
 0x4e4   :  { %1237 = vlog2.f32 %v836_v32 }
 0x4e5   :  { %v1228_v35 = vpop.eup %1227  ;;  %v830_v37 = vpop.xlane.xlu0 %829 }
 0x4e6   :  { %v858_v40 = vmul.f32 0.6931472, %v1228_v35  ;;  %1239 = vlog2.f32 %v830_v37 }
 0x4e7   :  { %v832_v41 = vpop.xlane.xlu1 %831 }
 0x4e8   :  { %v887_v43 = vadd.f32 %v858_v40, %v1511_v58  ;;  %1241 = vlog2.f32 %v832_v41 }
 0x4e9   :  { %v1230_v53 = vpop.eup %1229  ;;  %v842_v55 = vpop.xlane.xlu0 %841 }
 0x4ea   :  { %v1232_v56 = vpop.eup %1231  ;;  %v903_v59 = vsub.f32 %v1433_v49, %v887_v43  ;;  %v860_v60 = vmul.f32 0.6931472, %v1230_v53  ;;  %1243 = vlog2.f32 %v842_v55 }
 0x4eb   :  { %v854_v0 = vmul.f32 0.6931472, %v1232_v56  ;;  %v844_v4 = vpop.xlane.xlu1 %843 }
 0x4ec   :  { %919 = vst [vmem:[%s1661_s6 + $0x10] sm:$0xff] %v903_v59  ;;  %v888_v6 = vadd.f32 %v860_v60, %v1519_v8  ;;  %1245 = vlog2.f32 %v844_v4 }
 0x4ed   :  { %v1234_v7 = vpop.eup %1233  ;;  %v885_v58 = vadd.f32 %v854_v0, %v1515_v5  ;;  %v838_v9 = vpop.xlane.xlu0 %837 }
 0x4ee   :  { %v904_v10 = vsub.f32 %v1443_v22, %v888_v6  ;;  %v856_v13 = vmul.f32 0.6931472, %v1234_v7  ;;  %1247 = vlog2.f32 %v838_v9 }
 0x4ef   :  { %v1236_v49 = vpop.eup %1235  ;;  %v901_v14 = vsub.f32 %v1438_v52, %v885_v58  ;;  %v840_v16 = vpop.xlane.xlu1 %839 }
 0x4f0   :  { %920 = vst [vmem:[%s1661_s6 + $0x18] sm:$0xff] %v904_v10  ;;  %v886_v18 = vadd.f32 %v856_v13, %v1523_v11  ;;  %v866_v8 = vmul.f32 0.6931472, %v1236_v49  ;;  %1249 = vlog2.f32 %v840_v16 }
 0x4f1   :  { %v1238_v46 = vpop.eup %1237  ;;  %917 = vst [vmem:[%s1661_s6] sm:$0xff] %v901_v14  ;;  %v846_v22 = vpop.xlane.xlu0 %845 }
 0x4f2   :  { %v902_v5 = vsub.f32 %v1448_v25, %v886_v18  ;;  %v891_v48 = vadd.f32 %v866_v8, %v1527_v15  ;;  %v868_v52 = vmul.f32 0.6931472, %v1238_v46  ;;  %1251 = vlog2.f32 %v846_v22 }
 0x4f3   :  { %v1240_v19 = vpop.eup %1239 }
 0x4f4   :  { %918 = vst [vmem:[%s1661_s6 + $0x8] sm:$0xff] %v902_v5  ;;  %v907_v11 = vsub.f32 %v1453_v30, %v891_v48  ;;  %v892_v51 = vadd.f32 %v868_v52, %v1531_v17  ;;  %v862_v20 = vmul.f32 0.6931472, %v1240_v19 }
 0x4f5   :  { %v1242_v21 = vpop.eup %1241  ;;  %v848_v24 = vpop.xlane.xlu1 %847 }
 0x4f6   :  { %923 = vst [vmem:[%s1661_s6 + $0x30] sm:$0xff] %v907_v11  ;;  %v908_v25 = vsub.f32 %v1458_v33, %v892_v51  ;;  %v889_v15 = vadd.f32 %v862_v20, %v1535_v47  ;;  %v864_v26 = vmul.f32 0.6931472, %v1242_v21  ;;  %1253 = vlog2.f32 %v848_v24  ;;  %v850_v28 = vpop.xlane.xlu0 %849 }
 0x4f7   :  { %v1244_v29 = vpop.eup %1243  ;;  %1255 = vlog2.f32 %v850_v28 }
 0x4f8   :  { %924 = vst [vmem:[%s1661_s6 + $0x38] sm:$0xff] %v908_v25  ;;  %v905_v30 = vsub.f32 %v1463_v36, %v889_v15  ;;  %v890_v17 = vadd.f32 %v864_v26, %v1539_v50  ;;  %v874_v31 = vmul.f32 0.6931472, %v1244_v29 }
 0x4f9   :  { %v1246_v32 = vpop.eup %1245  ;;  %v852_v35 = vpop.xlane.xlu1 %851 }
 0x4fa   :  { %921 = vst [vmem:[%s1661_s6 + $0x20] sm:$0xff] %v905_v30  ;;  %v906_v33 = vsub.f32 %v1468_v38, %v890_v17  ;;  %v895_v47 = vadd.f32 %v874_v31, %v1543_v23  ;;  %v876_v37 = vmul.f32 0.6931472, %v1246_v32  ;;  %1257 = vlog2.f32 %v852_v35 }
 0x4fb   :  { %v1248_v40 = vpop.eup %1247 }
 0x4fc   :  { %922 = vst [vmem:[%s1661_s6 + $0x28] sm:$0xff] %v906_v33  ;;  %v911_v36 = vsub.f32 %v1473_v42, %v895_v47  ;;  %v896_v50 = vadd.f32 %v876_v37, %v1547_v27  ;;  %v870_v41 = vmul.f32 0.6931472, %v1248_v40 }
 0x4fd   :  { %v1250_v43 = vpop.eup %1249 }
 0x4fe   :  { %927 = vst [vmem:[%s1661_s6 + $0x50] sm:$0xff] %v911_v36  ;;  %v912_v38 = vsub.f32 %v1478_v45, %v896_v50  ;;  %v893_v23 = vadd.f32 %v870_v41, %v1551_v34  ;;  %v872_v53 = vmul.f32 0.6931472, %v1250_v43 }
 0x4ff   :  { %v1252_v55 = vpop.eup %1251 }
 0x500   :  { %928 = vst [vmem:[%s1661_s6 + $0x58] sm:$0xff] %v912_v38  ;;  %v909_v42 = vsub.f32 %v1483_v54, %v893_v23  ;;  %v894_v27 = vadd.f32 %v872_v53, %v1555_v39  ;;  %v878_v56 = vmul.f32 0.6931472, %v1252_v55 }
 0x502   :  { %925 = vst [vmem:[%s1661_s6 + $0x40] sm:$0xff] %v909_v42  ;;  %v910_v59 = vsub.f32 %v1488_v57, %v894_v27  ;;  %v897_v45 = vadd.f32 %v878_v56, %v1559_v44 }
 0x503   :  { %v1254_v34 = vpop.eup %1253 }
 0x504   :  { %v1256_v60 = vpop.eup %1255  ;;  %926 = vst [vmem:[%s1661_s6 + $0x48] sm:$0xff] %v910_v59  ;;  %v913_v0 = vsub.f32 %v1493_v61, %v897_v45  ;;  %v880_v54 = vmul.f32 0.6931472, %v1254_v34 }
 0x505   :  { %v882_v4 = vmul.f32 0.6931472, %v1256_v60 }
 0x506   :  { %929 = vst [vmem:[%s1661_s6 + $0x60] sm:$0xff] %v913_v0  ;;  %v898_v39 = vadd.f32 %v880_v54, %v1563_v62 }
 0x507   :  { %v1258_v6 = vpop.eup %1257  ;;  %v899_v57 = vadd.f32 %v882_v4, %v1565_v63 }
 0x508   :  { %v914_v44 = vsub.f32 %v1498_v1, %v898_v39  ;;  %v884_v7 = vmul.f32 0.6931472, %v1258_v6 }
 0x509   :  { %v915_v58 = vsub.f32 %v1502_v2, %v899_v57 }
 0x50a   :  { %930 = vst [vmem:[%s1661_s6 + $0x68] sm:$0xff] %v914_v44  ;;  %v900_v61 = vadd.f32 %v884_v7, %v1571_v12 }
 0x50b   :  { %931 = vst [vmem:[%s1661_s6 + $0x70] sm:$0xff] %v915_v58 }
 0x50c   :  { %v916_v62 = vsub.f32 %v1508_v3, %v900_v61 }
 0x50e   :  { %932 = vst [vmem:[%s1661_s6 + $0x78] sm:$0xff] %v916_v62 }

</bundles_post_ra>
